<compile_context>
chip_gen: v7x
topology: tpu7x:2x2x1
jax: 0.10.0
libtpu: 0.0.40
codegen_flags: <defaults>
</compile_context>

<pallas_src>
import numpy as np
import jax
import jax.numpy as jnp
from jax.experimental import pallas as pl
from jax.experimental.pallas import tpu as pltpu


def _identity_kernel(x_hbm_ref, o_hbm_ref, done_ref):
    # o_hbm_ref aliases x_hbm_ref (input_output_aliases={0: 0}), so the output
    # HBM buffer already contains x on kernel entry.  Unwritten regions of an
    # aliased output retain the input's bytes (same contract the in-place
    # KV-cache-update kernels rely on), so there is nothing to do: this kernel
    # moves zero bytes of HBM data.
    #
    # The single SMEM store below is a trivial keep-alive so the traced body is
    # not empty; it touches no HBM and costs a couple of scalar cycles.
    del x_hbm_ref, o_hbm_ref
    done_ref[0] = jnp.int32(1)


def identity(x):
    """Pallas identity: returns an array equal to x (same shape & dtype).

    Zero-copy: the output aliases the input buffer.  Donate x at the jit
    boundary (donate_argnums) to let XLA reuse the buffer with no copy at all;
    without donation XLA inserts exactly one copy, which is still strictly
    cheaper than the previous tiled VMEM round-trip kernel.
    """
    return pl.pallas_call(
        _identity_kernel,
        out_shape=jax.ShapeDtypeStruct(x.shape, x.dtype),
        # pl.ANY: leave both operands in place in HBM -- no auto-DMA, no
        # (8,128) tiling constraints, and nothing that could overwrite the
        # aliased output buffer.
        in_specs=[pl.BlockSpec(memory_space=pl.ANY)],
        out_specs=pl.BlockSpec(memory_space=pl.ANY),
        scratch_shapes=[pltpu.SMEM((1,), jnp.int32)],
        input_output_aliases={0: 0},
    )(x)


if __name__ == "__main__":
    key = jax.random.PRNGKey(0)
    N, C, H, W = 2, 4, 16, 16
    x = jax.random.normal(key, (N, C, H, W), dtype=jnp.float32)

    # Path 1: no donation -> XLA inserts one copy into the aliased output
    # buffer; x stays valid for the comparison below.
    out = jax.block_until_ready(jax.jit(identity)(x))
    assert out.shape == x.shape and out.dtype == x.dtype
    assert jnp.array_equal(out, x), "identity mismatch (f32)"

    # Path 2: donated input -> true zero-copy (the output reuses x2's HBM
    # buffer).  Keep a host copy for validation since x2's device buffer is
    # consumed by donation.  Also exercises an odd shape and bf16.
    x2 = jax.random.normal(jax.random.PRNGKey(1), (3, 5, 17, 130)).astype(jnp.bfloat16)
    x2_host = np.asarray(x2).astype(np.float32)
    out2 = jax.block_until_ready(jax.jit(identity, donate_argnums=0)(x2))
    assert out2.shape == (3, 5, 17, 130) and out2.dtype == jnp.bfloat16
    assert np.array_equal(np.asarray(out2).astype(np.float32), x2_host), \
        "identity mismatch (donated/bf16)"

    print("KERNEL_OK")
</pallas_src>

<mosaic_0001>
module attributes {stable_mosaic.version = 11 : i64} {
  func.func @_identity_kernel(%arg0: memref<2x4x16x16xf32, #tpu.memory_space<any>>, %arg1: memref<2x4x16x16xf32, #tpu.memory_space<any>>, %arg2: memref<1xi32, #tpu.memory_space<smem>>) attributes {dimension_semantics = [], scalar_prefetch = 0 : i64, scratch_operands = 1 : i64, tpu.core_type = #tpu.core_type<tc>} {
    %c1_i32 = arith.constant 1 : i32
    %c0 = arith.constant 0 : index
    %0 = memref.load %arg2[%c0] : memref<1xi32, #tpu.memory_space<smem>>
    memref.store %c1_i32, %arg2[%c0] : memref<1xi32, #tpu.memory_space<smem>>
    return
  }
}

</mosaic_0001>

<bundles_post_ra>
// kernel: identity.1
= control target key start
LH: loop header
LB: loop body
LE: loop exit
PB: predicated region body
PF: predicated region fallthrough
CT: control target
= control target key end

     0   :  { %s18_s0 = inlined_call_operand.hbm [shape: f32[2,4,16,16], index: 0, kind: input, shape index: {}, may-alias: {0,1}]   ;;  %s19_s1 = inlined_call_operand.hbm [shape: f32[2,4,16,16], index: 1, kind: output, shape index: {}, may-alias: {0,1}]  }

</bundles_post_ra>
